<compile_context>
chip_gen: v5e
topology: v5e:2x2
jax: 0.10.0
libtpu: 0.0.40
codegen_flags: <defaults>
</compile_context>

<pallas_src>
import jax
import jax.numpy as jnp
from jax.experimental import pallas as pl
from jax.experimental.pallas import tpu as pltpu


# Widest-first lane-dense candidates for the flattened view's last dim.
_LANE_CANDIDATES = (32768, 16384, 8192, 4096, 2048, 1024, 512, 256, 128)
# Per-DMA-chunk target size (descriptor overhead is negligible at this size).
_TARGET_CHUNK_BYTES = 8 * 1024 * 1024
# Above this total size, force >= 2 chunks so v7x's two TensorCores both work.
_MIN_SPLIT_BYTES = 1 * 1024 * 1024


def _flat_view_shape(total_elems: int):
    """Pick a lane-dense (rows, cols) flat view. Falls back to (1, total)."""
    for cols in _LANE_CANDIDATES:
        if total_elems % cols == 0:
            return total_elems // cols, cols
    # No 128-aligned factoring: single contiguous row. DMA does not care about
    # lane alignment for a whole-extent HBM->HBM copy.
    return 1, total_elems


def _chunk_rows(rows: int, cols: int, itemsize: int):
    """Rows per DMA chunk: ~_TARGET_CHUNK_BYTES, >=2 chunks for large arrays."""
    bytes_per_row = cols * itemsize
    total_bytes = rows * bytes_per_row
    block_rows = max(1, _TARGET_CHUNK_BYTES // bytes_per_row)
    if total_bytes > _MIN_SPLIT_BYTES and rows >= 2:
        # Guarantee at least 2 grid iterations (v7x megacore sharding).
        block_rows = min(block_rows, pl.cdiv(rows, 2))
    return min(block_rows, rows)


def _make_dma_copy_kernel(rows: int, block_rows: int):
    """Chunked HBM->HBM DMA identity copy. Refs live in pl.ANY (HBM)."""
    n_full = rows // block_rows
    rem = rows - n_full * block_rows

    def kernel(x_hbm, o_hbm, sem):
        i = pl.program_id(0)
        start = pl.multiple_of(i * block_rows, block_rows)

        if rem == 0:
            cp = pltpu.make_async_copy(
                x_hbm.at[pl.ds(start, block_rows), :],
                o_hbm.at[pl.ds(start, block_rows), :],
                sem,
            )
            cp.start()
            cp.wait()
        else:
            @pl.when(i < n_full)
            def _():
                cp = pltpu.make_async_copy(
                    x_hbm.at[pl.ds(start, block_rows), :],
                    o_hbm.at[pl.ds(start, block_rows), :],
                    sem,
                )
                cp.start()
                cp.wait()

            @pl.when(i == n_full)
            def _():
                cp = pltpu.make_async_copy(
                    x_hbm.at[pl.ds(start, rem), :],
                    o_hbm.at[pl.ds(start, rem), :],
                    sem,
                )
                cp.start()
                cp.wait()

    grid = n_full + (1 if rem > 0 else 0)
    return kernel, grid


def gs_appearance_forward(
    image: jax.Array,
    indices: jax.Array | None = None,
    *,
    use_kernel: bool = True,
) -> jax.Array:
    """Pallas implementation of GSAppearanceModel.forward (identity).

    Args:
      image:      (N, C, H, W) array (NCHW, matching the PyTorch module).
      indices:    camera indices -- unused by the dummy appearance model.
      use_kernel: production callers should pass False; any copy kernel costs
                  2 * image.nbytes of HBM traffic for zero semantic effect.

    Returns:
      Array equal to `image` (same shape / dtype).
    """
    del indices  # The dummy appearance model ignores camera indices.

    if not use_kernel:
        return image  # True optimum: the forward is a pass-through.

    itemsize = jnp.dtype(image.dtype).itemsize
    rows, cols = _flat_view_shape(image.size)
    block_rows = _chunk_rows(rows, cols, itemsize)
    kernel, grid = _make_dma_copy_kernel(rows, block_rows)

    flat = image.reshape(rows, cols)  # wrapper-side reshape: layout plumbing only
    nbytes = image.size * itemsize

    out_flat = pl.pallas_call(
        kernel,
        out_shape=jax.ShapeDtypeStruct((rows, cols), image.dtype),
        grid=(grid,),
        # Raw HBM refs -> the kernel body drives the copy with explicit DMA.
        in_specs=[pl.BlockSpec(memory_space=pl.ANY)],
        out_specs=pl.BlockSpec(memory_space=pl.ANY),
        scratch_shapes=[pltpu.SemaphoreType.DMA],
        cost_estimate=pl.CostEstimate(
            flops=0, transcendentals=0, bytes_accessed=2 * nbytes
        ),
        compiler_params=pltpu.CompilerParams(
            # Chunks are disjoint -> shardable across v7x's 2 TensorCores.
            dimension_semantics=("parallel",),
        ),
    )(flat)
    return out_flat.reshape(image.shape)


class GSAppearanceModel:
    """JAX/Pallas port of the (dummy) Gaussian Splatting appearance model."""

    def __init__(self, appearance_embedding_dim: int = 32, num_cameras: int = 1):
        # The PyTorch module registers no parameters; appearance_embedding_dim
        # is carried in the config but never used in forward.
        self.appearance_embedding_dim = appearance_embedding_dim
        self.num_cameras = num_cameras
        # TODO(synk): no learnable parameters exist in the reference module,
        # so there is nothing to initialize here.

    def __call__(self, image: jax.Array, indices: jax.Array) -> jax.Array:
        return gs_appearance_forward(image, indices)


if __name__ == "__main__":
    key = jax.random.PRNGKey(0)
    k_img, k_idx = jax.random.split(key)

    # Small NCHW image consistent with the module's forward signature.
    image = jax.random.normal(k_img, (2, 4, 16, 16), dtype=jnp.float32)
    indices = jax.random.randint(k_idx, (2,), 0, 4, dtype=jnp.int32)

    model = GSAppearanceModel(appearance_embedding_dim=32, num_cameras=4)
    out = model(image, indices)
    out = jax.block_until_ready(out)

    # Forward is an identity; verify exact pass-through semantics.
    assert out.shape == image.shape
    assert out.dtype == image.dtype
    assert bool(jnp.array_equal(out, image))

    print("KERNEL_OK")
</pallas_src>

<mosaic_0001>
module attributes {stable_mosaic.version = 11 : i64} {
  func.func @kernel(%arg0: i32, %arg1: memref<1x2048xf32, #tpu.memory_space<any>>, %arg2: memref<1x2048xf32, #tpu.memory_space<any>>, %arg3: memref<!tpu.dma_semaphore, #tpu.memory_space<semaphore_mem>>) attributes {dimension_semantics = [#tpu.dimension_semantics<parallel>], iteration_bounds = array<i64: 1>, scalar_prefetch = 0 : i64, scratch_operands = 1 : i64, tpu.core_type = #tpu.core_type<tc>, window_params = [{}, {}]} {
    %c1_i32 = arith.constant 1 : i32
    %0 = arith.muli %arg0, %c1_i32 : i32
    %1 = tpu.assume_multiple %0, 1 : i32
    %c0_i32 = arith.constant 0 : i32
    %2 = tpu.memref_slice %arg1[%1, %c0_i32] : memref<1x2048xf32, #tpu.memory_space<any>> -> memref<1x2048xf32, #tpu.memory_space<any>>
    %c0_i32_0 = arith.constant 0 : i32
    %3 = tpu.memref_slice %arg2[%1, %c0_i32_0] : memref<1x2048xf32, #tpu.memory_space<any>> -> memref<1x2048xf32, #tpu.memory_space<any>>
    tpu.enqueue_dma source(%2 : memref<1x2048xf32, #tpu.memory_space<any>>) target(%3 : memref<1x2048xf32, #tpu.memory_space<any>>) target_semaphore(%arg3 : memref<!tpu.dma_semaphore, #tpu.memory_space<semaphore_mem>>)
    %c0_i32_1 = arith.constant 0 : i32
    %4 = tpu.memref_slice %arg1[%1, %c0_i32_1] : memref<1x2048xf32, #tpu.memory_space<any>> -> memref<1x2048xf32, #tpu.memory_space<any>>
    %c0_i32_2 = arith.constant 0 : i32
    %5 = tpu.memref_slice %arg2[%1, %c0_i32_2] : memref<1x2048xf32, #tpu.memory_space<any>> -> memref<1x2048xf32, #tpu.memory_space<any>>
    tpu.wait_dma2 semaphore(%arg3 : memref<!tpu.dma_semaphore, #tpu.memory_space<semaphore_mem>>) src(%4 : memref<1x2048xf32, #tpu.memory_space<any>>) dst(%5 : memref<1x2048xf32, #tpu.memory_space<any>>)
    return
  }
}

</mosaic_0001>

<bundles_post_ra>
// kernel: tpu_custom_call.1
= control target key start
LH: loop header
LB: loop body
LE: loop exit
PB: predicated region body
PF: predicated region fallthrough
CT: control target
= control target key end

     0   :  { %s35_s12 = smov [#allocation2]   ;;  %s36_s13 = smov [#allocation3]   ;;  %s54_s0 = inlined_call_operand.hbm [shape: f32[1,2048], index: 0, kind: input, shape index: {}]   ;;  %s55_s1 = inlined_call_operand.hbm [shape: f32[1,2048], index: 1, kind: output, shape index: {}]  }
   0x1   :  { %s13_s8 = sshll.u32 %s54_s0, 4  ;;  %s15_s11 = sshll.u32 %s55_s1, 4  ;;  %s14_s8 = int_to_ptr.hbm [resolvable:$true] %s13_s8  ;;  %s16_s11 = int_to_ptr.hbm [resolvable:$true] %s15_s11 }
   0x2   :  { %s37_s14 = smov 0  }
   0x3   :  { %19 = dma.general %s14_s8, 256, %s16_s11, %s35_s12, %s36_s13, [#allocation4], %s37_s14, 0  }
   0x4   :  { %33 = dma.done.wait [#allocation2], 256 }
   0x5   :  { %34 = vsyncadd [#allocation2], 4294967040 }
   0x6   :  { %23 = vsyncmov [#allocation2] }
   0x9   :  { %s24_s15 = vpop.sfrf %23 }
   0xa   :  { %p29_p0 = scmp.ne.s32.totalorder %s24_s15, 0 }
   0xc   :  { %28 = shalt.err (%p29_p0)  }

</bundles_post_ra>
